<compile_context>
chip_gen: v7x
topology: tpu7x:2x2x1
jax: 0.10.0
libtpu: 0.0.40
codegen_flags: <defaults>
</compile_context>

<pallas_src>
import functools

import jax
import jax.numpy as jnp
import numpy as np
from jax.experimental import pallas as pl
from jax.experimental.pallas import tpu as pltpu


def _mish(z):
    """Mish with one exp + one approx reciprocal (kernel-side, f32)."""
    # tanh(softplus(z)) = ((1+e^z)^2 - 1) / ((1+e^z)^2 + 1)
    e = jnp.exp(jnp.minimum(z, 20.0))      # clamp: for z>20 the ratio is 1.0 in f32
    p = 1.0 + e
    q = p * p
    return z * (q - 1.0) * pl.reciprocal(q + 1.0, approx=True)


def _mish_exact(z):
    """Reference Mish (matches PyTorch nn.Mish)."""
    return z * jnp.tanh(jax.nn.softplus(z))


def _shift_cols(v, s):
    """out[:, p] = v[:, p + s]; positions outside [0, HW) are zero-filled."""
    if s == 0:
        return v
    n = v.shape[1]
    z = jnp.zeros((v.shape[0], abs(s)), v.dtype)
    if s > 0:
        return jnp.concatenate([v[:, s:], z], axis=1)
    return jnp.concatenate([z, v[:, : n + s]], axis=1)


def residual_block_kernel(x_ref, w1_ref, s1_ref, b1_ref, w3_ref, s2_ref, b2_ref,
                          o_ref, *, H, W, num_repeat):
    """All repeats of the ResidualBlock for one batch element (NCHW layout).

    x_ref  : (1, C, H*W)      input (flattened NCHW), spatial axis on lanes
    w1_ref : (R, Cmid, C)     1x1 conv weights, bf16
    s1/b1  : (R, Cmid, 1)     folded BN scale/bias (includes conv bias), f32
    w3_ref : (R, C, 9*Cmid)   3x3 conv weights, K index = (ky*3+kx)*Cmid+cin, bf16
    s2/b2  : (R, C, 1)        folded BN scale/bias, f32
    o_ref  : (1, C, H*W)      output
    """
    HW = H * W
    x = x_ref[0].astype(jnp.float32)                       # (C, HW)

    # W-boundary masks for the 3x3 taps (lane position p = h*W + w), hoisted.
    w_idx = jax.lax.broadcasted_iota(jnp.int32, (1, HW), 1) % W
    mask_l = w_idx >= 1           # dx = -1 neighbour exists
    mask_r = w_idx <= W - 2       # dx = +1 neighbour exists

    for r in range(num_repeat):                            # static unroll over repeats
        # ---- CNNBlock 1: 1x1 conv (channel matmul, bf16 MXU) + BN + Mish ----
        t = jnp.dot(w1_ref[r], x.astype(jnp.bfloat16),
                    preferred_element_type=jnp.float32)    # (Cmid, HW) f32
        t = _mish(t * s1_ref[r] + b1_ref[r])

        # ---- CNNBlock 2: 3x3 conv (padding=1) as ONE K=9*Cmid matmul ----
        # Build the im2col patch matrix in registers: lane shifts handle dy/dx
        # (zero fill covers the H boundary), the W mask handles column wrap.
        cols = []
        for ky in range(3):
            for kx in range(3):
                dy, dx = ky - 1, kx - 1
                col = _shift_cols(t, dy * W + dx)          # (Cmid, HW)
                if dx == -1:
                    col = jnp.where(mask_l, col, 0.0)
                elif dx == 1:
                    col = jnp.where(mask_r, col, 0.0)
                cols.append(col)
        patch = jnp.concatenate(cols, axis=0).astype(jnp.bfloat16)   # (9*Cmid, HW)
        y = jnp.dot(w3_ref[r], patch,
                    preferred_element_type=jnp.float32)    # (C, HW) f32
        y = _mish(y * s2_ref[r] + b2_ref[r])

        # ---- residual add ----
        x = x + y

    o_ref[0] = x.astype(o_ref.dtype)


def residual_block_pallas(x_nchw, stacked):
    """x_nchw: (N, C, H, W) f32 (PyTorch layout).  stacked: per-repeat params."""
    N, C, H, W = x_nchw.shape
    Cmid = C // 2
    R = stacked["w1"].shape[0]
    HW = H * W
    x2 = x_nchw.reshape(N, C, HW)          # free row-major collapse in the wrapper

    kernel = functools.partial(residual_block_kernel, H=H, W=W, num_repeat=R)

    out = pl.pallas_call(
        kernel,
        out_shape=jax.ShapeDtypeStruct((N, C, HW), x_nchw.dtype),
        grid_spec=pltpu.PrefetchScalarGridSpec(
            num_scalar_prefetch=0,
            grid=(N,),
            in_specs=[
                pl.BlockSpec((1, C, HW), lambda n: (n, 0, 0)),        # x (lane-dense)
                # Weight index_maps are constant -> fetched once, kept resident.
                pl.BlockSpec((R, Cmid, C), lambda n: (0, 0, 0)),      # w1 (bf16)
                pl.BlockSpec((R, Cmid, 1), lambda n: (0, 0, 0)),      # s1
                pl.BlockSpec((R, Cmid, 1), lambda n: (0, 0, 0)),      # b1
                pl.BlockSpec((R, C, 9 * Cmid), lambda n: (0, 0, 0)),  # w3 (bf16)
                pl.BlockSpec((R, C, 1), lambda n: (0, 0, 0)),         # s2
                pl.BlockSpec((R, C, 1), lambda n: (0, 0, 0)),         # b2
            ],
            out_specs=pl.BlockSpec((1, C, HW), lambda n: (n, 0, 0)),
        ),
        compiler_params=pltpu.CompilerParams(
            dimension_semantics=("parallel",)),
    )(x2, stacked["w1"], stacked["s1"], stacked["b1"],
      stacked["w3"], stacked["s2"], stacked["b2"])
    return out.reshape(N, C, H, W)


def make_layer_params(key, C):
    """Deterministic synthetic parameters for one repeat (conv + folded BN)."""
    Cmid = C // 2
    eps = 1e-5
    ks = jax.random.split(key, 12)

    # conv1: 1x1, Cin=C -> Cout=Cmid  (stored as (Cin, Cout))
    w1 = 0.1 * jax.random.normal(ks[0], (C, Cmid), jnp.float32)
    cb1 = 0.05 * jax.random.normal(ks[1], (Cmid,), jnp.float32)
    g1 = 1.0 + 0.1 * jax.random.normal(ks[2], (Cmid,), jnp.float32)
    beta1 = 0.1 * jax.random.normal(ks[3], (Cmid,), jnp.float32)
    mean1 = 0.1 * jax.random.normal(ks[4], (Cmid,), jnp.float32)
    var1 = jax.random.uniform(ks[5], (Cmid,), jnp.float32, 0.5, 1.5)

    # conv2: 3x3, Cin=Cmid -> Cout=C  (stored HWIO)
    w3 = 0.1 * jax.random.normal(ks[6], (3, 3, Cmid, C), jnp.float32)
    cb2 = 0.05 * jax.random.normal(ks[7], (C,), jnp.float32)
    g2 = 1.0 + 0.1 * jax.random.normal(ks[8], (C,), jnp.float32)
    beta2 = 0.1 * jax.random.normal(ks[9], (C,), jnp.float32)
    mean2 = 0.1 * jax.random.normal(ks[10], (C,), jnp.float32)
    var2 = jax.random.uniform(ks[11], (C,), jnp.float32, 0.5, 1.5)

    # Fold BN (inference mode) + conv bias into scale/bias.
    s1 = g1 / jnp.sqrt(var1 + eps)
    b1 = beta1 + s1 * (cb1 - mean1)
    s2 = g2 / jnp.sqrt(var2 + eps)
    b2 = beta2 + s2 * (cb2 - mean2)

    return dict(w1=w1, w3=w3, s1=s1, b1=b1, s2=s2, b2=b2)


def stack_params_for_kernel(layer_params):
    """Stack per-repeat params along a leading R axis in kernel layout."""
    C, Cmid = layer_params[0]["w1"].shape
    # 1x1 weights as (Cout, Cin) so the kernel computes w1 @ x  (x is (C, HW)).
    w1 = jnp.stack([p["w1"].T for p in layer_params]).astype(jnp.bfloat16)
    # 3x3 weights as (Cout, 9*Cmid) with K index order (ky, kx, cin).
    w3 = jnp.stack([p["w3"].reshape(9 * Cmid, C).T for p in layer_params]
                   ).astype(jnp.bfloat16)
    s1 = jnp.stack([p["s1"].reshape(Cmid, 1) for p in layer_params])
    b1 = jnp.stack([p["b1"].reshape(Cmid, 1) for p in layer_params])
    s2 = jnp.stack([p["s2"].reshape(C, 1) for p in layer_params])
    b2 = jnp.stack([p["b2"].reshape(C, 1) for p in layer_params])
    return dict(w1=w1, w3=w3, s1=s1, b1=b1, s2=s2, b2=b2)


def residual_block_ref(x, layer_params):
    """Pure-JAX f32 reference (NCHW) mirroring the PyTorch module."""
    N, C, H, W = x.shape
    Cmid = C // 2
    for p in layer_params:
        t = jax.lax.conv_general_dilated(
            x, p["w1"].reshape(1, 1, C, Cmid), (1, 1), "VALID",
            dimension_numbers=("NCHW", "HWIO", "NCHW"))
        t = _mish_exact(t * p["s1"].reshape(1, Cmid, 1, 1)
                        + p["b1"].reshape(1, Cmid, 1, 1))
        u = jax.lax.conv_general_dilated(
            t, p["w3"], (1, 1), ((1, 1), (1, 1)),
            dimension_numbers=("NCHW", "HWIO", "NCHW"))
        u = _mish_exact(u * p["s2"].reshape(1, C, 1, 1)
                        + p["b2"].reshape(1, C, 1, 1))
        x = x + u
    return x


if __name__ == "__main__":
    # Small shapes consistent with ResidualBlock(in_channels=16, num_repeat=2).
    N, C, H, W = 2, 16, 16, 16
    num_repeat = 2

    root = jax.random.PRNGKey(0)
    kx, *kls = jax.random.split(root, 1 + num_repeat)
    x = jax.random.normal(kx, (N, C, H, W), jnp.float32)     # layout: NCHW (PyTorch)

    layer_params = [make_layer_params(k, C) for k in kls]
    stacked = stack_params_for_kernel(layer_params)

    out = jax.block_until_ready(residual_block_pallas(x, stacked))
    ref = jax.block_until_ready(residual_block_ref(x, layer_params))

    # Tolerance covers bf16 matmul operands + approx-reciprocal Mish.
    np.testing.assert_allclose(np.asarray(out), np.asarray(ref),
                               rtol=2e-2, atol=2e-2)

    print("KERNEL_OK")
</pallas_src>

<mosaic_0001>
module attributes {stable_mosaic.version = 11 : i64} {
  func.func @residual_block_kernel(%arg0: i32, %arg1: memref<1x16x256xf32, #tpu.memory_space<vmem>>, %arg2: memref<2x8x16xbf16, #tpu.memory_space<vmem>>, %arg3: memref<2x8x1xf32, #tpu.memory_space<vmem>>, %arg4: memref<2x8x1xf32, #tpu.memory_space<vmem>>, %arg5: memref<2x16x72xbf16, #tpu.memory_space<vmem>>, %arg6: memref<2x16x1xf32, #tpu.memory_space<vmem>>, %arg7: memref<2x16x1xf32, #tpu.memory_space<vmem>>, %arg8: memref<1x16x256xf32, #tpu.memory_space<vmem>>) attributes {dimension_semantics = [#tpu.dimension_semantics<parallel>], iteration_bounds = array<i64: 2>, scalar_prefetch = 0 : i64, scratch_operands = 0 : i64, tpu.core_type = #tpu.core_type<tc>, window_params = [{transform_indices = @transform_0, window_bounds = array<i64: 1, 16, 256>}, {pipeline_mode = #tpu.pipeline_mode<synchronous>, transform_indices = @transform_1, window_bounds = array<i64: 2, 8, 16>}, {pipeline_mode = #tpu.pipeline_mode<synchronous>, transform_indices = @transform_2, window_bounds = array<i64: 2, 8, 1>}, {pipeline_mode = #tpu.pipeline_mode<synchronous>, transform_indices = @transform_3, window_bounds = array<i64: 2, 8, 1>}, {pipeline_mode = #tpu.pipeline_mode<synchronous>, transform_indices = @transform_4, window_bounds = array<i64: 2, 16, 72>}, {pipeline_mode = #tpu.pipeline_mode<synchronous>, transform_indices = @transform_5, window_bounds = array<i64: 2, 16, 1>}, {pipeline_mode = #tpu.pipeline_mode<synchronous>, transform_indices = @transform_6, window_bounds = array<i64: 2, 16, 1>}, {transform_indices = @transform_7, window_bounds = array<i64: 1, 16, 256>}]} {
    %c0 = arith.constant 0 : index
    %c0_0 = arith.constant 0 : index
    %c0_1 = arith.constant 0 : index
    %0 = vector.load %arg1[%c0, %c0_0, %c0_1] : memref<1x16x256xf32, #tpu.memory_space<vmem>>, vector<1x16x256xf32>
    %1 = vector.shape_cast %0 : vector<1x16x256xf32> to vector<16x256xf32>
    %2 = tpu.iota {dimensions = array<i32: 1>} : vector<1x256xi32>
    %c16_i32 = arith.constant 16 : i32
    %c0_i32 = arith.constant 0 : i32
    %3 = arith.cmpi eq, %c16_i32, %c0_i32 : i32
    %c1_i32 = arith.constant 1 : i32
    %4 = arith.select %3, %c1_i32, %c16_i32 : i32
    %5 = vector.broadcast %4 : i32 to vector<1x256xi32>
    %6 = arith.remsi %2, %5 : vector<1x256xi32>
    %c0_i32_2 = arith.constant 0 : i32
    %7 = vector.broadcast %c0_i32_2 : i32 to vector<1x256xi32>
    %8 = arith.cmpi ne, %6, %7 : vector<1x256xi32>
    %c0_i32_3 = arith.constant 0 : i32
    %9 = vector.broadcast %c0_i32_3 : i32 to vector<1x256xi32>
    %10 = arith.cmpi slt, %6, %9 : vector<1x256xi32>
    %c0_i32_4 = arith.constant 0 : i32
    %11 = arith.cmpi slt, %4, %c0_i32_4 : i32
    %12 = vector.broadcast %11 : i1 to vector<1x256xi1>
    %13 = vector.broadcast %12 : vector<1x256xi1> to vector<1x256xi1>
    %14 = arith.xori %10, %13 : vector<1x256xi1>
    %15 = arith.andi %14, %8 : vector<1x256xi1>
    %16 = vector.broadcast %4 : i32 to vector<1x256xi32>
    %17 = arith.addi %6, %16 : vector<1x256xi32>
    %18 = arith.select %15, %17, %6 : vector<1x256xi1>, vector<1x256xi32>
    %c1_i32_5 = arith.constant 1 : i32
    %19 = vector.broadcast %c1_i32_5 : i32 to vector<1x256xi32>
    %20 = arith.cmpi sge, %18, %19 : vector<1x256xi32>
    %c14_i32 = arith.constant 14 : i32
    %21 = vector.broadcast %c14_i32 : i32 to vector<1x256xi32>
    %22 = arith.cmpi sle, %18, %21 : vector<1x256xi32>
    %c0_6 = arith.constant 0 : index
    %c0_7 = arith.constant 0 : index
    %c0_8 = arith.constant 0 : index
    %23 = vector.load %arg2[%c0_6, %c0_7, %c0_8] : memref<2x8x16xbf16, #tpu.memory_space<vmem>>, vector<1x8x16xbf16>
    %24 = vector.shape_cast %23 : vector<1x8x16xbf16> to vector<8x16xbf16>
    %25 = arith.truncf %1 : vector<16x256xf32> to vector<16x256xbf16>
    %cst = arith.constant dense<0.000000e+00> : vector<8x256xf32>
    %26 = tpu.matmul %24, %25, %cst {dimension_numbers = #tpu.dot_dimension_numbers<[1], [0], [0], [1], [0, 0, 1, 1], [], []>} : vector<8x16xbf16>, vector<16x256xbf16>, vector<8x256xf32> -> vector<8x256xf32>
    %c0_9 = arith.constant 0 : index
    %c0_10 = arith.constant 0 : index
    %c0_11 = arith.constant 0 : index
    %27 = vector.load %arg3[%c0_9, %c0_10, %c0_11] : memref<2x8x1xf32, #tpu.memory_space<vmem>>, vector<1x8x1xf32>
    %28 = vector.shape_cast %27 : vector<1x8x1xf32> to vector<8x1xf32>
    %29 = vector.broadcast %28 : vector<8x1xf32> to vector<8x256xf32>
    %30 = arith.mulf %26, %29 : vector<8x256xf32>
    %c0_12 = arith.constant 0 : index
    %c0_13 = arith.constant 0 : index
    %c0_14 = arith.constant 0 : index
    %31 = vector.load %arg4[%c0_12, %c0_13, %c0_14] : memref<2x8x1xf32, #tpu.memory_space<vmem>>, vector<1x8x1xf32>
    %32 = vector.shape_cast %31 : vector<1x8x1xf32> to vector<8x1xf32>
    %33 = vector.broadcast %32 : vector<8x1xf32> to vector<8x256xf32>
    %34 = arith.addf %30, %33 : vector<8x256xf32>
    %cst_15 = arith.constant 2.000000e+01 : f32
    %35 = vector.broadcast %cst_15 : f32 to vector<8x256xf32>
    %36 = arith.minimumf %34, %35 : vector<8x256xf32>
    %37 = math.exp %36 : vector<8x256xf32>
    %cst_16 = arith.constant 1.000000e+00 : f32
    %38 = vector.broadcast %cst_16 : f32 to vector<8x256xf32>
    %39 = arith.addf %38, %37 : vector<8x256xf32>
    %40 = arith.mulf %39, %39 : vector<8x256xf32>
    %cst_17 = arith.constant 1.000000e+00 : f32
    %41 = vector.broadcast %cst_17 : f32 to vector<8x256xf32>
    %42 = arith.subf %40, %41 : vector<8x256xf32>
    %43 = arith.mulf %34, %42 : vector<8x256xf32>
    %cst_18 = arith.constant 1.000000e+00 : f32
    %44 = vector.broadcast %cst_18 : f32 to vector<8x256xf32>
    %45 = arith.addf %40, %44 : vector<8x256xf32>
    %46 = tpu.reciprocal %45 {approx = true} : vector<8x256xf32> -> vector<8x256xf32>
    %47 = arith.mulf %43, %46 : vector<8x256xf32>
    %cst_19 = arith.constant 0.000000e+00 : f32
    %48 = vector.broadcast %cst_19 : f32 to vector<8x17xf32>
    %49 = vector.extract_strided_slice %47 {offsets = [0, 0], sizes = [8, 239], strides = [1, 1]} : vector<8x256xf32> to vector<8x239xf32>
    %50 = tpu.concatenate %48, %49 in 1 : vector<8x17xf32>, vector<8x239xf32> -> vector<8x256xf32>
    %cst_20 = arith.constant 0.000000e+00 : f32
    %51 = vector.shape_cast %20 : vector<1x256xi1> to vector<1x256xi1>
    %52 = vector.broadcast %51 : vector<1x256xi1> to vector<8x256xi1>
    %53 = vector.broadcast %cst_20 : f32 to vector<8x256xf32>
    %54 = arith.select %52, %50, %53 : vector<8x256xi1>, vector<8x256xf32>
    %cst_21 = arith.constant 0.000000e+00 : f32
    %55 = vector.broadcast %cst_21 : f32 to vector<8x16xf32>
    %56 = vector.extract_strided_slice %47 {offsets = [0, 0], sizes = [8, 240], strides = [1, 1]} : vector<8x256xf32> to vector<8x240xf32>
    %57 = tpu.concatenate %55, %56 in 1 : vector<8x16xf32>, vector<8x240xf32> -> vector<8x256xf32>
    %cst_22 = arith.constant 0.000000e+00 : f32
    %58 = vector.broadcast %cst_22 : f32 to vector<8x15xf32>
    %59 = vector.extract_strided_slice %47 {offsets = [0, 0], sizes = [8, 241], strides = [1, 1]} : vector<8x256xf32> to vector<8x241xf32>
    %60 = tpu.concatenate %58, %59 in 1 : vector<8x15xf32>, vector<8x241xf32> -> vector<8x256xf32>
    %cst_23 = arith.constant 0.000000e+00 : f32
    %61 = vector.shape_cast %22 : vector<1x256xi1> to vector<1x256xi1>
    %62 = vector.broadcast %61 : vector<1x256xi1> to vector<8x256xi1>
    %63 = vector.broadcast %cst_23 : f32 to vector<8x256xf32>
    %64 = arith.select %62, %60, %63 : vector<8x256xi1>, vector<8x256xf32>
    %cst_24 = arith.constant 0.000000e+00 : f32
    %65 = vector.broadcast %cst_24 : f32 to vector<8x1xf32>
    %66 = vector.extract_strided_slice %47 {offsets = [0, 0], sizes = [8, 255], strides = [1, 1]} : vector<8x256xf32> to vector<8x255xf32>
    %67 = tpu.concatenate %65, %66 in 1 : vector<8x1xf32>, vector<8x255xf32> -> vector<8x256xf32>
    %cst_25 = arith.constant 0.000000e+00 : f32
    %68 = vector.shape_cast %20 : vector<1x256xi1> to vector<1x256xi1>
    %69 = vector.broadcast %68 : vector<1x256xi1> to vector<8x256xi1>
    %70 = vector.broadcast %cst_25 : f32 to vector<8x256xf32>
    %71 = arith.select %69, %67, %70 : vector<8x256xi1>, vector<8x256xf32>
    %cst_26 = arith.constant 0.000000e+00 : f32
    %72 = vector.broadcast %cst_26 : f32 to vector<8x1xf32>
    %73 = vector.extract_strided_slice %47 {offsets = [0, 1], sizes = [8, 255], strides = [1, 1]} : vector<8x256xf32> to vector<8x255xf32>
    %74 = tpu.concatenate %73, %72 in 1 : vector<8x255xf32>, vector<8x1xf32> -> vector<8x256xf32>
    %cst_27 = arith.constant 0.000000e+00 : f32
    %75 = vector.shape_cast %22 : vector<1x256xi1> to vector<1x256xi1>
    %76 = vector.broadcast %75 : vector<1x256xi1> to vector<8x256xi1>
    %77 = vector.broadcast %cst_27 : f32 to vector<8x256xf32>
    %78 = arith.select %76, %74, %77 : vector<8x256xi1>, vector<8x256xf32>
    %cst_28 = arith.constant 0.000000e+00 : f32
    %79 = vector.broadcast %cst_28 : f32 to vector<8x15xf32>
    %80 = vector.extract_strided_slice %47 {offsets = [0, 15], sizes = [8, 241], strides = [1, 1]} : vector<8x256xf32> to vector<8x241xf32>
    %81 = tpu.concatenate %80, %79 in 1 : vector<8x241xf32>, vector<8x15xf32> -> vector<8x256xf32>
    %cst_29 = arith.constant 0.000000e+00 : f32
    %82 = vector.shape_cast %20 : vector<1x256xi1> to vector<1x256xi1>
    %83 = vector.broadcast %82 : vector<1x256xi1> to vector<8x256xi1>
    %84 = vector.broadcast %cst_29 : f32 to vector<8x256xf32>
    %85 = arith.select %83, %81, %84 : vector<8x256xi1>, vector<8x256xf32>
    %cst_30 = arith.constant 0.000000e+00 : f32
    %86 = vector.broadcast %cst_30 : f32 to vector<8x16xf32>
    %87 = vector.extract_strided_slice %47 {offsets = [0, 16], sizes = [8, 240], strides = [1, 1]} : vector<8x256xf32> to vector<8x240xf32>
    %88 = tpu.concatenate %87, %86 in 1 : vector<8x240xf32>, vector<8x16xf32> -> vector<8x256xf32>
    %cst_31 = arith.constant 0.000000e+00 : f32
    %89 = vector.broadcast %cst_31 : f32 to vector<8x17xf32>
    %90 = vector.extract_strided_slice %47 {offsets = [0, 17], sizes = [8, 239], strides = [1, 1]} : vector<8x256xf32> to vector<8x239xf32>
    %91 = tpu.concatenate %90, %89 in 1 : vector<8x239xf32>, vector<8x17xf32> -> vector<8x256xf32>
    %cst_32 = arith.constant 0.000000e+00 : f32
    %92 = vector.shape_cast %22 : vector<1x256xi1> to vector<1x256xi1>
    %93 = vector.broadcast %92 : vector<1x256xi1> to vector<8x256xi1>
    %94 = vector.broadcast %cst_32 : f32 to vector<8x256xf32>
    %95 = arith.select %93, %91, %94 : vector<8x256xi1>, vector<8x256xf32>
    %96 = tpu.concatenate %54, %57, %64, %71, %47, %78, %85, %88, %95 in 0 : vector<8x256xf32>, vector<8x256xf32>, vector<8x256xf32>, vector<8x256xf32>, vector<8x256xf32>, vector<8x256xf32>, vector<8x256xf32>, vector<8x256xf32>, vector<8x256xf32> -> vector<72x256xf32>
    %97 = arith.truncf %96 : vector<72x256xf32> to vector<72x256xbf16>
    %c0_33 = arith.constant 0 : index
    %c0_34 = arith.constant 0 : index
    %c0_35 = arith.constant 0 : index
    %98 = vector.load %arg5[%c0_33, %c0_34, %c0_35] : memref<2x16x72xbf16, #tpu.memory_space<vmem>>, vector<1x16x72xbf16>
    %99 = vector.shape_cast %98 : vector<1x16x72xbf16> to vector<16x72xbf16>
    %cst_36 = arith.constant dense<0.000000e+00> : vector<16x256xf32>
    %100 = tpu.matmul %99, %97, %cst_36 {dimension_numbers = #tpu.dot_dimension_numbers<[1], [0], [0], [1], [0, 0, 1, 1], [], []>} : vector<16x72xbf16>, vector<72x256xbf16>, vector<16x256xf32> -> vector<16x256xf32>
    %c0_37 = arith.constant 0 : index
    %c0_38 = arith.constant 0 : index
    %c0_39 = arith.constant 0 : index
    %101 = vector.load %arg6[%c0_37, %c0_38, %c0_39] : memref<2x16x1xf32, #tpu.memory_space<vmem>>, vector<1x16x1xf32>
    %102 = vector.shape_cast %101 : vector<1x16x1xf32> to vector<16x1xf32>
    %103 = vector.broadcast %102 : vector<16x1xf32> to vector<16x256xf32>
    %104 = arith.mulf %100, %103 : vector<16x256xf32>
    %c0_40 = arith.constant 0 : index
    %c0_41 = arith.constant 0 : index
    %c0_42 = arith.constant 0 : index
    %105 = vector.load %arg7[%c0_40, %c0_41, %c0_42] : memref<2x16x1xf32, #tpu.memory_space<vmem>>, vector<1x16x1xf32>
    %106 = vector.shape_cast %105 : vector<1x16x1xf32> to vector<16x1xf32>
    %107 = vector.broadcast %106 : vector<16x1xf32> to vector<16x256xf32>
    %108 = arith.addf %104, %107 : vector<16x256xf32>
    %cst_43 = arith.constant 2.000000e+01 : f32
    %109 = vector.broadcast %cst_43 : f32 to vector<16x256xf32>
    %110 = arith.minimumf %108, %109 : vector<16x256xf32>
    %111 = math.exp %110 : vector<16x256xf32>
    %cst_44 = arith.constant 1.000000e+00 : f32
    %112 = vector.broadcast %cst_44 : f32 to vector<16x256xf32>
    %113 = arith.addf %112, %111 : vector<16x256xf32>
    %114 = arith.mulf %113, %113 : vector<16x256xf32>
    %cst_45 = arith.constant 1.000000e+00 : f32
    %115 = vector.broadcast %cst_45 : f32 to vector<16x256xf32>
    %116 = arith.subf %114, %115 : vector<16x256xf32>
    %117 = arith.mulf %108, %116 : vector<16x256xf32>
    %cst_46 = arith.constant 1.000000e+00 : f32
    %118 = vector.broadcast %cst_46 : f32 to vector<16x256xf32>
    %119 = arith.addf %114, %118 : vector<16x256xf32>
    %120 = tpu.reciprocal %119 {approx = true} : vector<16x256xf32> -> vector<16x256xf32>
    %121 = arith.mulf %117, %120 : vector<16x256xf32>
    %122 = arith.addf %1, %121 : vector<16x256xf32>
    %c1 = arith.constant 1 : index
    %c0_47 = arith.constant 0 : index
    %c0_48 = arith.constant 0 : index
    %123 = vector.load %arg2[%c1, %c0_47, %c0_48] : memref<2x8x16xbf16, #tpu.memory_space<vmem>>, vector<1x8x16xbf16>
    %124 = vector.shape_cast %123 : vector<1x8x16xbf16> to vector<8x16xbf16>
    %125 = arith.truncf %122 : vector<16x256xf32> to vector<16x256xbf16>
    %cst_49 = arith.constant dense<0.000000e+00> : vector<8x256xf32>
    %126 = tpu.matmul %124, %125, %cst_49 {dimension_numbers = #tpu.dot_dimension_numbers<[1], [0], [0], [1], [0, 0, 1, 1], [], []>} : vector<8x16xbf16>, vector<16x256xbf16>, vector<8x256xf32> -> vector<8x256xf32>
    %c1_50 = arith.constant 1 : index
    %c0_51 = arith.constant 0 : index
    %c0_52 = arith.constant 0 : index
    %127 = vector.load %arg3[%c1_50, %c0_51, %c0_52] : memref<2x8x1xf32, #tpu.memory_space<vmem>>, vector<1x8x1xf32>
    %128 = vector.shape_cast %127 : vector<1x8x1xf32> to vector<8x1xf32>
    %129 = vector.broadcast %128 : vector<8x1xf32> to vector<8x256xf32>
    %130 = arith.mulf %126, %129 : vector<8x256xf32>
    %c1_53 = arith.constant 1 : index
    %c0_54 = arith.constant 0 : index
    %c0_55 = arith.constant 0 : index
    %131 = vector.load %arg4[%c1_53, %c0_54, %c0_55] : memref<2x8x1xf32, #tpu.memory_space<vmem>>, vector<1x8x1xf32>
    %132 = vector.shape_cast %131 : vector<1x8x1xf32> to vector<8x1xf32>
    %133 = vector.broadcast %132 : vector<8x1xf32> to vector<8x256xf32>
    %134 = arith.addf %130, %133 : vector<8x256xf32>
    %cst_56 = arith.constant 2.000000e+01 : f32
    %135 = vector.broadcast %cst_56 : f32 to vector<8x256xf32>
    %136 = arith.minimumf %134, %135 : vector<8x256xf32>
    %137 = math.exp %136 : vector<8x256xf32>
    %cst_57 = arith.constant 1.000000e+00 : f32
    %138 = vector.broadcast %cst_57 : f32 to vector<8x256xf32>
    %139 = arith.addf %138, %137 : vector<8x256xf32>
    %140 = arith.mulf %139, %139 : vector<8x256xf32>
    %cst_58 = arith.constant 1.000000e+00 : f32
    %141 = vector.broadcast %cst_58 : f32 to vector<8x256xf32>
    %142 = arith.subf %140, %141 : vector<8x256xf32>
    %143 = arith.mulf %134, %142 : vector<8x256xf32>
    %cst_59 = arith.constant 1.000000e+00 : f32
    %144 = vector.broadcast %cst_59 : f32 to vector<8x256xf32>
    %145 = arith.addf %140, %144 : vector<8x256xf32>
    %146 = tpu.reciprocal %145 {approx = true} : vector<8x256xf32> -> vector<8x256xf32>
    %147 = arith.mulf %143, %146 : vector<8x256xf32>
    %cst_60 = arith.constant 0.000000e+00 : f32
    %148 = vector.broadcast %cst_60 : f32 to vector<8x17xf32>
    %149 = vector.extract_strided_slice %147 {offsets = [0, 0], sizes = [8, 239], strides = [1, 1]} : vector<8x256xf32> to vector<8x239xf32>
    %150 = tpu.concatenate %148, %149 in 1 : vector<8x17xf32>, vector<8x239xf32> -> vector<8x256xf32>
    %cst_61 = arith.constant 0.000000e+00 : f32
    %151 = vector.shape_cast %20 : vector<1x256xi1> to vector<1x256xi1>
    %152 = vector.broadcast %151 : vector<1x256xi1> to vector<8x256xi1>
    %153 = vector.broadcast %cst_61 : f32 to vector<8x256xf32>
    %154 = arith.select %152, %150, %153 : vector<8x256xi1>, vector<8x256xf32>
    %cst_62 = arith.constant 0.000000e+00 : f32
    %155 = vector.broadcast %cst_62 : f32 to vector<8x16xf32>
    %156 = vector.extract_strided_slice %147 {offsets = [0, 0], sizes = [8, 240], strides = [1, 1]} : vector<8x256xf32> to vector<8x240xf32>
    %157 = tpu.concatenate %155, %156 in 1 : vector<8x16xf32>, vector<8x240xf32> -> vector<8x256xf32>
    %cst_63 = arith.constant 0.000000e+00 : f32
    %158 = vector.broadcast %cst_63 : f32 to vector<8x15xf32>
    %159 = vector.extract_strided_slice %147 {offsets = [0, 0], sizes = [8, 241], strides = [1, 1]} : vector<8x256xf32> to vector<8x241xf32>
    %160 = tpu.concatenate %158, %159 in 1 : vector<8x15xf32>, vector<8x241xf32> -> vector<8x256xf32>
    %cst_64 = arith.constant 0.000000e+00 : f32
    %161 = vector.shape_cast %22 : vector<1x256xi1> to vector<1x256xi1>
    %162 = vector.broadcast %161 : vector<1x256xi1> to vector<8x256xi1>
    %163 = vector.broadcast %cst_64 : f32 to vector<8x256xf32>
    %164 = arith.select %162, %160, %163 : vector<8x256xi1>, vector<8x256xf32>
    %cst_65 = arith.constant 0.000000e+00 : f32
    %165 = vector.broadcast %cst_65 : f32 to vector<8x1xf32>
    %166 = vector.extract_strided_slice %147 {offsets = [0, 0], sizes = [8, 255], strides = [1, 1]} : vector<8x256xf32> to vector<8x255xf32>
    %167 = tpu.concatenate %165, %166 in 1 : vector<8x1xf32>, vector<8x255xf32> -> vector<8x256xf32>
    %cst_66 = arith.constant 0.000000e+00 : f32
    %168 = vector.shape_cast %20 : vector<1x256xi1> to vector<1x256xi1>
    %169 = vector.broadcast %168 : vector<1x256xi1> to vector<8x256xi1>
    %170 = vector.broadcast %cst_66 : f32 to vector<8x256xf32>
    %171 = arith.select %169, %167, %170 : vector<8x256xi1>, vector<8x256xf32>
    %cst_67 = arith.constant 0.000000e+00 : f32
    %172 = vector.broadcast %cst_67 : f32 to vector<8x1xf32>
    %173 = vector.extract_strided_slice %147 {offsets = [0, 1], sizes = [8, 255], strides = [1, 1]} : vector<8x256xf32> to vector<8x255xf32>
    %174 = tpu.concatenate %173, %172 in 1 : vector<8x255xf32>, vector<8x1xf32> -> vector<8x256xf32>
    %cst_68 = arith.constant 0.000000e+00 : f32
    %175 = vector.shape_cast %22 : vector<1x256xi1> to vector<1x256xi1>
    %176 = vector.broadcast %175 : vector<1x256xi1> to vector<8x256xi1>
    %177 = vector.broadcast %cst_68 : f32 to vector<8x256xf32>
    %178 = arith.select %176, %174, %177 : vector<8x256xi1>, vector<8x256xf32>
    %cst_69 = arith.constant 0.000000e+00 : f32
    %179 = vector.broadcast %cst_69 : f32 to vector<8x15xf32>
    %180 = vector.extract_strided_slice %147 {offsets = [0, 15], sizes = [8, 241], strides = [1, 1]} : vector<8x256xf32> to vector<8x241xf32>
    %181 = tpu.concatenate %180, %179 in 1 : vector<8x241xf32>, vector<8x15xf32> -> vector<8x256xf32>
    %cst_70 = arith.constant 0.000000e+00 : f32
    %182 = vector.shape_cast %20 : vector<1x256xi1> to vector<1x256xi1>
    %183 = vector.broadcast %182 : vector<1x256xi1> to vector<8x256xi1>
    %184 = vector.broadcast %cst_70 : f32 to vector<8x256xf32>
    %185 = arith.select %183, %181, %184 : vector<8x256xi1>, vector<8x256xf32>
    %cst_71 = arith.constant 0.000000e+00 : f32
    %186 = vector.broadcast %cst_71 : f32 to vector<8x16xf32>
    %187 = vector.extract_strided_slice %147 {offsets = [0, 16], sizes = [8, 240], strides = [1, 1]} : vector<8x256xf32> to vector<8x240xf32>
    %188 = tpu.concatenate %187, %186 in 1 : vector<8x240xf32>, vector<8x16xf32> -> vector<8x256xf32>
    %cst_72 = arith.constant 0.000000e+00 : f32
    %189 = vector.broadcast %cst_72 : f32 to vector<8x17xf32>
    %190 = vector.extract_strided_slice %147 {offsets = [0, 17], sizes = [8, 239], strides = [1, 1]} : vector<8x256xf32> to vector<8x239xf32>
    %191 = tpu.concatenate %190, %189 in 1 : vector<8x239xf32>, vector<8x17xf32> -> vector<8x256xf32>
    %cst_73 = arith.constant 0.000000e+00 : f32
    %192 = vector.shape_cast %22 : vector<1x256xi1> to vector<1x256xi1>
    %193 = vector.broadcast %192 : vector<1x256xi1> to vector<8x256xi1>
    %194 = vector.broadcast %cst_73 : f32 to vector<8x256xf32>
    %195 = arith.select %193, %191, %194 : vector<8x256xi1>, vector<8x256xf32>
    %196 = tpu.concatenate %154, %157, %164, %171, %147, %178, %185, %188, %195 in 0 : vector<8x256xf32>, vector<8x256xf32>, vector<8x256xf32>, vector<8x256xf32>, vector<8x256xf32>, vector<8x256xf32>, vector<8x256xf32>, vector<8x256xf32>, vector<8x256xf32> -> vector<72x256xf32>
    %197 = arith.truncf %196 : vector<72x256xf32> to vector<72x256xbf16>
    %c1_74 = arith.constant 1 : index
    %c0_75 = arith.constant 0 : index
    %c0_76 = arith.constant 0 : index
    %198 = vector.load %arg5[%c1_74, %c0_75, %c0_76] : memref<2x16x72xbf16, #tpu.memory_space<vmem>>, vector<1x16x72xbf16>
    %199 = vector.shape_cast %198 : vector<1x16x72xbf16> to vector<16x72xbf16>
    %cst_77 = arith.constant dense<0.000000e+00> : vector<16x256xf32>
    %200 = tpu.matmul %199, %197, %cst_77 {dimension_numbers = #tpu.dot_dimension_numbers<[1], [0], [0], [1], [0, 0, 1, 1], [], []>} : vector<16x72xbf16>, vector<72x256xbf16>, vector<16x256xf32> -> vector<16x256xf32>
    %c1_78 = arith.constant 1 : index
    %c0_79 = arith.constant 0 : index
    %c0_80 = arith.constant 0 : index
    %201 = vector.load %arg6[%c1_78, %c0_79, %c0_80] : memref<2x16x1xf32, #tpu.memory_space<vmem>>, vector<1x16x1xf32>
    %202 = vector.shape_cast %201 : vector<1x16x1xf32> to vector<16x1xf32>
    %203 = vector.broadcast %202 : vector<16x1xf32> to vector<16x256xf32>
    %204 = arith.mulf %200, %203 : vector<16x256xf32>
    %c1_81 = arith.constant 1 : index
    %c0_82 = arith.constant 0 : index
    %c0_83 = arith.constant 0 : index
    %205 = vector.load %arg7[%c1_81, %c0_82, %c0_83] : memref<2x16x1xf32, #tpu.memory_space<vmem>>, vector<1x16x1xf32>
    %206 = vector.shape_cast %205 : vector<1x16x1xf32> to vector<16x1xf32>
    %207 = vector.broadcast %206 : vector<16x1xf32> to vector<16x256xf32>
    %208 = arith.addf %204, %207 : vector<16x256xf32>
    %cst_84 = arith.constant 2.000000e+01 : f32
    %209 = vector.broadcast %cst_84 : f32 to vector<16x256xf32>
    %210 = arith.minimumf %208, %209 : vector<16x256xf32>
    %211 = math.exp %210 : vector<16x256xf32>
    %cst_85 = arith.constant 1.000000e+00 : f32
    %212 = vector.broadcast %cst_85 : f32 to vector<16x256xf32>
    %213 = arith.addf %212, %211 : vector<16x256xf32>
    %214 = arith.mulf %213, %213 : vector<16x256xf32>
    %cst_86 = arith.constant 1.000000e+00 : f32
    %215 = vector.broadcast %cst_86 : f32 to vector<16x256xf32>
    %216 = arith.subf %214, %215 : vector<16x256xf32>
    %217 = arith.mulf %208, %216 : vector<16x256xf32>
    %cst_87 = arith.constant 1.000000e+00 : f32
    %218 = vector.broadcast %cst_87 : f32 to vector<16x256xf32>
    %219 = arith.addf %214, %218 : vector<16x256xf32>
    %220 = tpu.reciprocal %219 {approx = true} : vector<16x256xf32> -> vector<16x256xf32>
    %221 = arith.mulf %217, %220 : vector<16x256xf32>
    %222 = arith.addf %122, %221 : vector<16x256xf32>
    %c0_88 = arith.constant 0 : index
    %c0_89 = arith.constant 0 : index
    %c0_90 = arith.constant 0 : index
    %223 = vector.load %arg8[%c0_88, %c0_89, %c0_90] : memref<1x16x256xf32, #tpu.memory_space<vmem>>, vector<1x16x256xf32>
    %224 = vector.shape_cast %223 : vector<1x16x256xf32> to vector<16x256xf32>
    %225 = vector.shape_cast %222 : vector<16x256xf32> to vector<1x16x256xf32>
    tpu.vector_store %arg8[%c0_88, %c0_89, %c0_90], %225 {strides = array<i32>} : memref<1x16x256xf32, #tpu.memory_space<vmem>>, vector<1x16x256xf32>,
    return
  }
  func.func @transform_0(%arg0: i32) -> (i32, i32, i32) {
    %c0_i32 = arith.constant 0 : i32
    %c0_i32_0 = arith.constant 0 : i32
    %c0_i32_1 = arith.constant 0 : i32
    return %arg0, %c0_i32, %c0_i32_0 : i32, i32, i32
  }
  func.func @transform_1(%arg0: i32) -> (i32, i32, i32) {
    %c0_i32 = arith.constant 0 : i32
    %c0_i32_0 = arith.constant 0 : i32
    %c0_i32_1 = arith.constant 0 : i32
    %c0_i32_2 = arith.constant 0 : i32
    return %c0_i32, %c0_i32_0, %c0_i32_1 : i32, i32, i32
  }
  func.func @transform_2(%arg0: i32) -> (i32, i32, i32) {
    %c0_i32 = arith.constant 0 : i32
    %c0_i32_0 = arith.constant 0 : i32
    %c0_i32_1 = arith.constant 0 : i32
    %c0_i32_2 = arith.constant 0 : i32
    return %c0_i32, %c0_i32_0, %c0_i32_1 : i32, i32, i32
  }
  func.func @transform_3(%arg0: i32) -> (i32, i32, i32) {
    %c0_i32 = arith.constant 0 : i32
    %c0_i32_0 = arith.constant 0 : i32
    %c0_i32_1 = arith.constant 0 : i32
    %c0_i32_2 = arith.constant 0 : i32
    return %c0_i32, %c0_i32_0, %c0_i32_1 : i32, i32, i32
  }
  func.func @transform_4(%arg0: i32) -> (i32, i32, i32) {
    %c0_i32 = arith.constant 0 : i32
    %c0_i32_0 = arith.constant 0 : i32
    %c0_i32_1 = arith.constant 0 : i32
    %c0_i32_2 = arith.constant 0 : i32
    return %c0_i32, %c0_i32_0, %c0_i32_1 : i32, i32, i32
  }
  func.func @transform_5(%arg0: i32) -> (i32, i32, i32) {
    %c0_i32 = arith.constant 0 : i32
    %c0_i32_0 = arith.constant 0 : i32
    %c0_i32_1 = arith.constant 0 : i32
    %c0_i32_2 = arith.constant 0 : i32
    return %c0_i32, %c0_i32_0, %c0_i32_1 : i32, i32, i32
  }
  func.func @transform_6(%arg0: i32) -> (i32, i32, i32) {
    %c0_i32 = arith.constant 0 : i32
    %c0_i32_0 = arith.constant 0 : i32
    %c0_i32_1 = arith.constant 0 : i32
    %c0_i32_2 = arith.constant 0 : i32
    return %c0_i32, %c0_i32_0, %c0_i32_1 : i32, i32, i32
  }
  func.func @transform_7(%arg0: i32) -> (i32, i32, i32) {
    %c0_i32 = arith.constant 0 : i32
    %c0_i32_0 = arith.constant 0 : i32
    %c0_i32_1 = arith.constant 0 : i32
    return %arg0, %c0_i32, %c0_i32_0 : i32, i32, i32
  }
}

</mosaic_0001>

<bundles_post_ra>
// kernel: tpu_custom_call.1
= control target key start
LH: loop header
LB: loop body
LE: loop exit
PB: predicated region body
PF: predicated region fallthrough
CT: control target
= control target key end

     0   :  { %12 = vsyncpa [#allocation3], 0  ;;  %s1812_s0 = inlined_call_operand.vmem [shape: f32[2,16,256], index: 0, kind: input, shape index: {}]   ;;  %s1813_s1 = inlined_call_operand.vmem [shape: bf16[2,8,16], index: 1, kind: input, shape index: {}]   ;;  %s1814_s2 = inlined_call_operand.vmem [shape: f32[2,8,1], index: 2, kind: input, shape index: {}]   ;;  %s1815_s3 = inlined_call_operand.vmem [shape: f32[2,8,1], index: 3, kind: input, shape index: {}]   ;;  %s1816_s4 = inlined_call_operand.vmem [shape: bf16[2,16,72], index: 4, kind: input, shape index: {}]   ;;  %s1817_s5 = inlined_call_operand.vmem [shape: f32[2,16,1], index: 5, kind: input, shape index: {}]   ;;  %s1818_s6 = inlined_call_operand.vmem [shape: f32[2,16,1], index: 6, kind: input, shape index: {}]   ;;  %s1819_s7 = inlined_call_operand.hbm [shape: f32[2,16,256], index: 7, kind: output, shape index: {}]  }
   0x1   :  { %14 = vsyncpa [#allocation3 + $0x1], 0  ;;  %s1420_s24 = smov 0   ;;  %s1422_s25 = smov 0  }
   0x2   :  { %s1424_s26 = smov 0   ;;  %s1426_s27 = smov 0  }
   0x3 LB: > { %s1441_s28 = sadd.s32 4294967295, %s1366_s27   ;;  %s1029_s29 = sadd.s32 4294967294, %s1366_s27   ;;  %s1366_s27 = sphi %s1426_s27, %s1869_s27   ;;  %s1362_s26 = sphi %s1424_s26, %s1868_s26   ;;  %s1358_s25 = sphi %s1422_s25, %s1867_s25   ;;  %s1354_s24 = sphi %s1420_s24, %s1866_s24  }
   0x4   : > { %s1445_s30 = sadd.s32 1, %s1366_s27   ;;  %s179_s8 = sadd.s32 1, %s1362_s26 }
   0x5   : > { %s176_s9 = ssub.s32 %s1366_s27, %s1445_s30  ;;  %p189_p0 = scmp.ne.s32.totalorder %s1362_s26, %s1358_s25 }
   0x6   : > { %p177_p1 = scmp.eq.s32.totalorder %s176_s9, 0  ;;  %p190_p2 = scmp.eq.s32.totalorder %s1441_s28, 1 }
   0x7   : > { %p195_p3 = scmp.ne.s32.totalorder %s1358_s25, %s1354_s24  ;;  %p196_p4 = scmp.eq.s32.totalorder %s1029_s29, 1 }
   0x8   : > { %s1456_s10 = scalar_select %p177_p1, %s1362_s26, %s179_s8  }
   0x9   : > { %p1458_p5 = por %p190_p2, %p189_p0  ;;  %p1462_p6 = por %p196_p4, %p195_p3 }
   0xa   : > { %p1032_p7 = scmp.ge.s32.totalorder %s1366_s27, 1  ;;  %p240_p8 = scmp.lt.s32.totalorder %s1366_s27, 3 }
   0xc   : > { %p241_p9 = pnand %p1032_p7, %p240_p8 }
   0xd   : > { %p272_p10 = scmp.lt.s32.totalorder (!%p241_p9), %s1441_s28, 1  ;;  %v361_v0 = vld [vmem:[%s1814_s2] sm:$0xff] (!%p241_p9)  ;;  %v1368_v1 = vmov (!%p241_p9), 0   ;;  %vm316_vm0 = vcmask (!%p241_p9), 130048   ;;  %s1369_s29 = smov (!%p241_p9), 15   ;;  %v1073_v44 = vld [vmem:[%s1814_s2 + $0x8] sm:$0xff] (!%p241_p9)  ;;  %v282_v48 = vlaneseq (!%p241_p9) }
   0xe   : > { %244 = sbr.rel (%p241_p9) target bundleno = 1353 (0x549), region = 48  ;;  %352 = vmatprep.mubr.bf16.mxu1 (!%p241_p9), %v1368_v1  ;;  %1172 = vset.pattern.permute.xlu0 (!%p241_p9), %v1368_v1  ;;  %v369_v2 = vld [vmem:[%s1815_s3] sm:$0xff] (!%p241_p9)  ;;  %s1370_s8 = smov (!%p241_p9), 17   ;;  %v562_v45 = vld [vmem:[%s1817_s5 + $0x8] sm:$0xff] (!%p241_p9)  ;;  %vm403_vm1 = vcmask (!%p241_p9), 138240   ;;  %vm1543_vm4 = vmneg (!%p241_p9), %vm316_vm0  ;;  %vm1824_vm5 = vcmask (!%p241_p9), 121856  }
   0xf   : > { %364 = vperm.xlu0 (!%p241_p9), %1172, %v361_v0   ;;  %1213 = vset.pattern.permute.xlu1 (!%p241_p9), %v1368_v1  ;;  %v313_v9 = vld [vmem:[%s1813_s1] sm:$0xf] (!%p241_p9)  ;;  %s1821_s9 = smov (!%p241_p9), 127   ;;  %s1372_s13 = smov (!%p241_p9), 16   ;;  %v578_v46 = vld [vmem:[%s1818_s6 + $0x8] sm:$0xff] (!%p241_p9)  ;;  %v283_v49 = vand.u32 (!%p241_p9), 127, %v282_v48 }
  0x10   : > { %676 = vmatprep.mubr.bf16.mxu0 (!%p241_p9), %v1368_v1  ;;  %s1820_s14 = smov (!%p241_p9), 112   ;;  %v561_v42 = vld [vmem:[%s1817_s5] sm:$0xff] (!%p241_p9)  ;;  %v1074_v47 = vld [vmem:[%s1815_s3 + $0x8] sm:$0xff] (!%p241_p9)  ;;  %vm1823_vm6 = vcmask (!%p241_p9), 1039360   ;;  %vm1377_vm7 = vmmov (!%p241_p9), 1   ;;  %vm441_vm9 = vcmask (!%p241_p9), 7168  }
  0x11   : > { %v577_v43 = vld [vmem:[%s1818_s6] sm:$0xff] (!%p241_p9)  ;;  %v284_v50 = vadd.s32 (!%p241_p9), 128, %v283_v49  ;;  %v289_v54 = vand.u32 (!%p241_p9), 15, %v283_v49  ;;  %vm1827_vm14 = vcmask (!%p241_p9), 924672   ;;  %s1852_s16 = smov (!%p241_p9), 127   ;;  %s1853_s17 = smov (!%p241_p9), 112  }
  0x12   : > { %s269_s23 = sand.u32 (!%p241_p9), 1, %s1358_s25  }
  0x13   : > { %372 = vperm.xlu0 (!%p241_p9), %1172, %v369_v2   ;;  %v296_v53 = vand.u32 (!%p241_p9), 15, %v284_v50  ;;  %vm1538_vm3 = vcmp.ge.s32.totalorder (!%p241_p9), %v289_v54, 1  ;;  %vm1565_vm12 = vcmp.le.s32.totalorder (!%p241_p9), %v289_v54, 14 }
  0x14   : > { %vm1822_vm10 = vmpackc.low (!%p241_p9), %vm1543_vm4, %vm1538_vm3 }
  0x15   : > { %s273_s15 = scalar_select %p272_p10, %s1441_s28, 1  ;;  %vm1534_vm2 = vcmp.ge.s32.totalorder %v296_v53, 1  ;;  %vm1561_vm11 = vcmp.le.s32.totalorder %v296_v53, 14  ;;  %vm1826_vm15 = vmpackc.low %vm1538_vm3, %vm1565_vm12 }
  0x16   : > { %vm1552_vm8 = vmpackc.low %vm1377_vm7, %vm1534_vm2 }
  0x17   : > { %s1120_s18 = sshll.u32 %s273_s15, 5  ;;  %s1374_s15 = smov 1   ;;  %vm1825_vm13 = vmpackc.low %vm1534_vm2, %vm1561_vm11 }
  0x18   : > { %s276_s21 = scalar_lea.vmem %s1812_s0, %s1120_s18  ;;  %s1375_s18 = smov 113  }
  0x19   : > { %v1483_v3 = vld [vmem:[%s276_s21 + $0x8] sm:$0xff]  ;;  %v1485_v4 = vld [vmem:[%s276_s21 + $0x18] sm:$0xff]  ;;  %v1487_v5 = vld [vmem:[%s276_s21] sm:$0xff] }
  0x1a   : > { %v315_v6 = vpack.c.bf16 %v1485_v4, %v1483_v3  ;;  %v1491_v7 = vld [vmem:[%s276_s21 + $0x10] sm:$0xff]  ;;  %s1376_s21 = smov 111  }
  0x1b   : > { %v314_v8 = vpack.c.bf16 %v1491_v7, %v1487_v5 }
  0x1c   : > { %320 = vmatprep.subr.bf16.mxu1 %v315_v6 }
  0x1d   : > { %321 = vmatpush1.bf16.msra.mxu1 %v314_v8 }
  0x20   : > { %1036 = vmatmul.mubr.msk.bf16.vlgmr.msra.gmra.mrb[0].mxu1 %vm316_vm0, %v313_v9 }
  0x21   : > { %550 = vmatprep.mubr.bf16.mxu1 %v1368_v1 }
  0x8e   : > { %v365_v10 = vpop.permute.xlu0 %364 }
  0x92   : > { %v373_v14 = vpop.permute.xlu0 %372 }
  0xf3   : > { %v354_v11 = vpop.f32.mrb[0].mxu1 }
  0xf4   : > { %v367_v12 = vmul.f32 %v365_v10, %v354_v11  ;;  %v356_v13 = vpop.f32.mrb[1].mxu1 }
  0xf5   : > { %v368_v15 = vmul.f32 %v365_v10, %v356_v13  ;;  %v358_v16 = vpop.f32.mrb[2].mxu1 }
  0xf6   : > { %v375_v17 = vadd.f32 %v373_v14, %v367_v12  ;;  %v359_v18 = vpop.f32.mrb[3].mxu1 }
  0xf7   : > { %v376_v19 = vadd.f32 %v373_v14, %v368_v15  ;;  %v1255_v14 = vld [vmem:[%s1816_s4 + $0x8] sm:$0xff]  }
  0xf8   : > { %v377_v20 = vmin.f32 %v375_v17, 20.0 }
  0xf9   : > { %v378_v21 = vmin.f32 %v376_v19, 20.0 }
  0xfa   : > { %v379_v22 = vmul.f32 1.442695, %v377_v20 }
  0xfb   : > { %v381_v23 = vmul.f32 1.442695, %v378_v21 }
  0xfc   : > { %1256 = vpow2.f32 %v379_v22 }
  0xfd   : > { %1258 = vpow2.f32 %v381_v23 }
 0x106   : > { %v1257_v24 = vpop.eup %1256 }
 0x107   : > { %v1259_v25 = vpop.eup %1258  ;;  %v383_v26 = vadd.f32 1.0, %v1257_v24 }
 0x108   : > { %v384_v27 = vadd.f32 1.0, %v1259_v25 }
 0x109   : > { %v385_v28 = vmul.f32 %v383_v26, %v383_v26 }
 0x10a   : > { %v386_v29 = vmul.f32 %v384_v27, %v384_v27 }
 0x10b   : > { %v391_v30 = vadd.f32 1.0, %v385_v28  ;;  %v1037_v32 = vadd.f32 -1.0, %v385_v28 }
 0x10c   : > { %v392_v31 = vadd.f32 1.0, %v386_v29  ;;  %v1038_v33 = vadd.f32 -1.0, %v386_v29 }
 0x10d   : > { %1260 = vrcp.f32 %v391_v30  ;;  %v389_v34 = vmul.f32 %v1037_v32, %v375_v17 }
 0x10e   : > { %1262 = vrcp.f32 %v392_v31  ;;  %v390_v36 = vmul.f32 %v1038_v33, %v376_v19 }
 0x117   : > { %v1261_v35 = vpop.eup %1260 }
 0x118   : > { %v1263_v37 = vpop.eup %1262  ;;  %v1500_v38 = vmul.f32 %v1261_v35, %v389_v34 }
 0x119   : > { %v1502_v39 = vmul.f32 %v1263_v37, %v390_v36 }
 0x11b   : > { %v1183_v40 = vpack.i.bf16 %v1502_v39, %v1500_v38  ;;  %v1193_v41 = vpack.i.bf16 %v1500_v38, %v1502_v39 }
 0x11d   : > { %1184 = vrot.lane.b32.xlu0 %v1183_v40, %s1369_s29  ;;  %1174 = vrot.lane.b32.xlu1 %v1183_v40, %s1370_s8 }
 0x121   : > { %1194 = vrot.lane.b32.xlu0 %v1193_v41, %s1821_s9  ;;  %1179 = vrot.lane.b32.xlu1 %v1183_v40, %s1372_s13 }
 0x125   : > { %1204 = vrot.lane.b32.xlu0 %v1183_v40, %s1820_s14  ;;  %1189 = vrot.lane.b32.xlu1 %v1183_v40, %s1374_s15 }
 0x129   : > { %565 = vperm.xlu0 %1172, %v561_v42   ;;  %1199 = vrot.lane.b32.xlu1 %v1193_v41, %s1375_s18 }
 0x12d   : > { %581 = vperm.xlu0 %1172, %v577_v43   ;;  %1209 = vrot.lane.b32.xlu1 %v1183_v40, %s1376_s21 }
 0x131   : > { %689 = vperm.xlu0 %1172, %v1073_v44   ;;  %570 = vperm.xlu1 %1213, %v562_v45  }
 0x135   : > { %586 = vperm.xlu1 %1213, %v578_v46  }
 0x139   : > { %698 = vperm.xlu1 %1213, %v1074_v47  }
 0x18f   : > { %v1185_v51 = vpop.permute.xlu0 %1184  ;;  %v1175_v52 = vpop.permute.xlu1 %1174 }
 0x190   : > { %v1177_v55 = vunpack.i.h.bf16 %v1175_v52  ;;  %v1176_v56 = vunpack.i.l.bf16 %v1175_v52  ;;  %v1187_v0 = vunpack.i.h.bf16 %v1185_v51  ;;  %v1186_v2 = vunpack.i.l.bf16 %v1185_v51 }
 0x192   : > { %v404_v6 = vsel %vm403_vm1, %v1176_v56, %v1177_v55  ;;  %v407_v11 = vsel %vm403_vm1, 0.0, %v1176_v56  ;;  %v427_v19 = vsel %vm1824_vm5, %v1186_v2, %v1187_v0  ;;  %v430_v21 = vsel %vm1824_vm5, 0.0, %v1186_v2  ;;  %vm1614_vm5 = vmpackc.low %vm1565_vm12, %vm1377_vm7  ;;  %v1254_v55 = vld [vmem:[%s1816_s4] sm:$0xff]  }
 0x193   : > { %v1195_v57 = vpop.permute.xlu0 %1194  ;;  %v1180_v58 = vpop.permute.xlu1 %1179 }
 0x194   : > { %v1182_v60 = vunpack.i.h.bf16 %v1180_v58  ;;  %v1181_v61 = vunpack.i.l.bf16 %v1180_v58  ;;  %v1196_v8 = vunpack.i.l.bf16 %v1195_v57  ;;  %v1197_v20 = vunpack.i.h.bf16 %v1195_v57 }
 0x196   : > { %v418_v9 = vsel %vm316_vm0, %v1181_v61, %v1182_v60  ;;  %v1045_v15 = vpack.c.bf16 %v1181_v61, %v407_v11  ;;  %v456_v22 = vsel %vm1823_vm6, %v1196_v8, 0.0  ;;  %v453_v31 = vsel %vm1823_vm6, %v1197_v20, %v1196_v8 }
 0x197   : > { %v1041_v12 = vpack.c.bf16 %v418_v9, %v404_v6  ;;  %v1190_v13 = vpop.permute.xlu1 %1189  ;;  %v1205_v28 = vpop.permute.xlu0 %1204  ;;  %v1054_v32 = vpack.c.bf16 %v456_v22, %v1502_v39  ;;  %vm1828_vm6 = vcmask 908288   ;;  %v1057_v40 = vpack.c.bf16 %v453_v31, %v1500_v38 }
 0x198   : > { %v1192_v16 = vunpack.i.h.bf16 %v1190_v13  ;;  %v1191_v17 = vunpack.i.l.bf16 %v1190_v13  ;;  %v1207_v35 = vunpack.i.h.bf16 %v1205_v28  ;;  %v1206_v36 = vunpack.i.l.bf16 %v1205_v28 }
 0x199   : > { %1042 = vmatprep.subr.msk.bf16.mxu1 %vm1552_vm8, %v1041_v12 }
 0x19a   : > { %v442_v23 = vsel %vm441_vm9, %v1191_v17, %v1192_v16  ;;  %v445_v24 = vsel %vm441_vm9, 0.0, %v1191_v17  ;;  %1046 = vmatpush1.bf16.msk.msra.mxu1 %vm1822_vm10, %v1045_v15  ;;  %vm1592_vm10 = vmpackc.low %vm1561_vm11, %vm1377_vm7 }
 0x19b   : > { %v1048_v25 = vpack.c.bf16 %v442_v23, %v427_v19  ;;  %v1051_v26 = vpack.c.bf16 %v445_v24, %v430_v21  ;;  %v1200_v27 = vpop.permute.xlu1 %1199 }
 0x19c   : > { %v1201_v29 = vunpack.i.l.bf16 %v1200_v27  ;;  %v1202_v33 = vunpack.i.h.bf16 %v1200_v27 }
 0x19d   : > { %1049 = vmatprep.subr.msk.bf16.mxu1 %vm1825_vm13, %v1048_v25  ;;  %vm474_vm13 = vcmask 916480  }
 0x19e   : > { %v467_v34 = vsel %vm1827_vm14, %v1201_v29, 0.0  ;;  %1052 = vmatpush1.bf16.msk.msra.mxu1 %vm1826_vm15, %v1051_v26  ;;  %vm1622_vm15 = vmpackc.low %vm474_vm13, %vm1534_vm2  ;;  %v464_v44 = vsel %vm1827_vm14, %v1202_v33, %v1201_v29  ;;  %v475_v48 = vsel %vm474_vm13, %v1206_v36, %v1207_v35 }
 0x19f   : > { %v1210_v37 = vpop.permute.xlu1 %1209  ;;  %1055 = vmatprep.subr.msk.bf16.mxu1 %vm1592_vm10, %v1054_v32  ;;  %v1060_v45 = vpack.c.bf16 %v1207_v35, %v467_v34  ;;  %vm1639_vm14 = vmpackc.low %vm1377_vm7, %vm1538_vm3  ;;  %v1063_v52 = vpack.c.bf16 %v475_v48, %v464_v44  ;;  %vm1829_vm7 = vcmask 588800  }
 0x1a0   : > { %v1212_v41 = vunpack.i.h.bf16 %v1210_v37  ;;  %v1211_v42 = vunpack.i.l.bf16 %v1210_v37 }
 0x1a2   : > { %v487_v46 = vsel %vm1828_vm6, %v1212_v41, 0.0  ;;  %v484_v47 = vsel %vm1828_vm6, %v1211_v42, %v1212_v41  ;;  %1058 = vmatpush1.bf16.msk.msra.mxu1 %vm1614_vm5, %v1057_v40  ;;  %vm511_vm6 = vcmask 1043456  }
 0x1a3   : > { %v489_v38 = vsel %vm1561_vm11, %v487_v46, 0.0  ;;  %1061 = vmatprep.subr.msk.bf16.mxu1 %vm1622_vm15, %v1060_v45  ;;  %v488_v50 = vsel %vm1565_vm12, %v484_v47, 0.0 }
 0x1a4   : > { %v499_v51 = vpack.c.bf16 %v489_v38, %v489_v38  ;;  %v498_v53 = vpack.c.bf16 %v488_v50, %v488_v50 }
 0x1a6   : > { %1064 = vmatpush1.bf16.msk.msra.mxu1 %vm1639_vm14, %v1063_v52  ;;  %v513_v54 = vsel %vm511_vm6, %v498_v53, 0 }
 0x1a7   : > { %1065 = vmatprep.subr.msk.bf16.mxu1 %vm511_vm6, %v499_v51 }
 0x1a8   : > { %v566_v56 = vpop.permute.xlu0 %565 }
 0x1aa   : > { %527 = vmatpush1.bf16.msra.mxu1 %v513_v54 }
 0x1ac   : > { %v582_v0 = vpop.permute.xlu0 %581 }
 0x1ad   : > { %1066 = vmatmul.mubr.msk.bf16.vlgmr.msra.gmra.mrb[4].mxu1 %vm1829_vm7, %v1254_v55 }
 0x1b0   : > { %v571_v57 = vpop.permute.xlu1 %570 }
 0x1b4   : > { %v587_v12 = vpop.permute.xlu1 %586 }
 0x280   : > { %v552_v58 = vpop.f32.mrb[4].mxu1 }
 0x281   : > { %v573_v60 = vmul.f32 %v566_v56, %v552_v58  ;;  %v554_v61 = vpop.f32.mrb[5].mxu1 }
 0x282   : > { %v574_v2 = vmul.f32 %v566_v56, %v554_v61  ;;  %v556_v6 = vpop.f32.mrb[6].mxu1 }
 0x283   : > { %v589_v8 = vadd.f32 %v582_v0, %v573_v60  ;;  %v575_v9 = vmul.f32 %v571_v57, %v556_v6  ;;  %v558_v11 = vpop.f32.mrb[7].mxu1 }
 0x284   : > { %v590_v13 = vadd.f32 %v582_v0, %v574_v2  ;;  %v576_v15 = vmul.f32 %v571_v57, %v558_v11 }
 0x285   : > { %v593_v16 = vmin.f32 %v589_v8, 20.0  ;;  %v591_v17 = vadd.f32 %v587_v12, %v575_v9 }
 0x286   : > { %v594_v19 = vmin.f32 %v590_v13, 20.0  ;;  %v592_v20 = vadd.f32 %v587_v12, %v576_v15 }
 0x287   : > { %v597_v21 = vmul.f32 1.442695, %v593_v16  ;;  %v595_v22 = vmin.f32 %v591_v17, 20.0  ;;  %v699_v16 = vpop.permute.xlu1 %698 }
 0x288   : > { %v599_v23 = vmul.f32 1.442695, %v594_v19  ;;  %v596_v24 = vmin.f32 %v592_v20, 20.0 }
 0x289   : > { %1264 = vpow2.f32 %v597_v21  ;;  %v601_v25 = vmul.f32 1.442695, %v595_v22 }
 0x28a   : > { %1266 = vpow2.f32 %v599_v23  ;;  %v603_v26 = vmul.f32 1.442695, %v596_v24 }
 0x28b   : > { %1268 = vpow2.f32 %v601_v25 }
 0x28c   : > { %1270 = vpow2.f32 %v603_v26 }
 0x293   : > { %v1265_v27 = vpop.eup %1264 }
 0x294   : > { %v1267_v28 = vpop.eup %1266  ;;  %v605_v29 = vadd.f32 1.0, %v1265_v27 }
 0x295   : > { %v1269_v31 = vpop.eup %1268  ;;  %v606_v32 = vadd.f32 1.0, %v1267_v28 }
 0x296   : > { %v1271_v33 = vpop.eup %1270  ;;  %v609_v34 = vmul.f32 %v605_v29, %v605_v29  ;;  %v607_v35 = vadd.f32 1.0, %v1269_v31 }
 0x297   : > { %v610_v36 = vmul.f32 %v606_v32, %v606_v32  ;;  %v608_v37 = vadd.f32 1.0, %v1271_v33 }
 0x298   : > { %v621_v40 = vadd.f32 1.0, %v609_v34  ;;  %v611_v41 = vmul.f32 %v607_v35, %v607_v35  ;;  %v1067_v38 = vadd.f32 -1.0, %v609_v34 }
 0x299   : > { %v622_v42 = vadd.f32 1.0, %v610_v36  ;;  %v612_v44 = vmul.f32 %v608_v37, %v608_v37  ;;  %v1068_v47 = vadd.f32 -1.0, %v610_v36 }
 0x29a   : > { %1272 = vrcp.f32 %v621_v40  ;;  %v623_v45 = vadd.f32 1.0, %v611_v41  ;;  %v1069_v48 = vadd.f32 -1.0, %v611_v41  ;;  %v617_v54 = vmul.f32 %v1067_v38, %v589_v8  ;;  %v1108_v38 = vld [vmem:[%s1817_s5 + $0x18] sm:$0xff] }
 0x29b   : > { %1274 = vrcp.f32 %v622_v42  ;;  %v624_v46 = vadd.f32 1.0, %v612_v44  ;;  %v1070_v50 = vadd.f32 -1.0, %v612_v44  ;;  %v618_v52 = vmul.f32 %v1068_v47, %v590_v13 }
 0x29c   : > { %1276 = vrcp.f32 %v623_v45  ;;  %v619_v55 = vmul.f32 %v1069_v48, %v591_v17  ;;  %v1107_v48 = vld [vmem:[%s1817_s5 + $0x10] sm:$0xff] }
 0x29d   : > { %1278 = vrcp.f32 %v624_v46  ;;  %v620_v57 = vmul.f32 %v1070_v50, %v592_v20  ;;  %v1110_v50 = vld [vmem:[%s1818_s6 + $0x18] sm:$0xff] }
 0x2a4   : > { %v1273_v51 = vpop.eup %1272 }
 0x2a5   : > { %v1275_v53 = vpop.eup %1274  ;;  %v629_v61 = vmul.f32 %v1273_v51, %v617_v54  ;;  %v1109_v51 = vld [vmem:[%s1818_s6 + $0x10] sm:$0xff] }
 0x2a6   : > { %v1277_v56 = vpop.eup %1276  ;;  %v630_v58 = vmul.f32 %v1275_v53, %v618_v52 }
 0x2a7   : > { %v1279_v60 = vpop.eup %1278  ;;  %v631_v0 = vmul.f32 %v1277_v56, %v619_v55  ;;  %v1663_v12 = vadd.f32 %v629_v61, %v1487_v5 }
 0x2a8   : > { %v632_v2 = vmul.f32 %v1279_v60, %v620_v57  ;;  %v1657_v9 = vadd.f32 %v630_v58, %v1483_v3  ;;  %v690_v3 = vpop.permute.xlu0 %689 }
 0x2a9   : > { %v1654_v6 = vadd.f32 %v631_v0, %v1491_v7  ;;  %v1071_v7 = vld [vmem:[%s1813_s1 + $0x4] sm:$0xf] }
 0x2aa   : > { %v1660_v11 = vadd.f32 %v632_v2, %v1485_v4 }
 0x2ab   : > { %v639_v13 = vpack.c.bf16 %v1654_v6, %v1663_v12 }
 0x2ac   : > { %v640_v8 = vpack.c.bf16 %v1660_v11, %v1657_v9 }
 0x2ae   : > { %644 = vmatprep.subr.bf16.mxu0 %v640_v8 }
 0x2af   : > { %645 = vmatpush1.bf16.msra.mxu0 %v639_v13 }
 0x2b2   : > { %1072 = vmatmul.mubr.msk.bf16.vlgmr.msra.gmra.mrb[0].mxu0 %vm316_vm0, %v1071_v7 }
 0x2b3   : > { %860 = vmatprep.mubr.bf16.mxu0 %v1368_v1 }
 0x385   : > { %v678_v4 = vpop.f32.mrb[0].mxu0 }
 0x386   : > { %v692_v5 = vmul.f32 %v690_v3, %v678_v4  ;;  %v680_v15 = vpop.f32.mrb[1].mxu0 }
 0x387   : > { %v693_v17 = vmul.f32 %v690_v3, %v680_v15  ;;  %v682_v19 = vpop.f32.mrb[2].mxu0 }
 0x388   : > { %v701_v20 = vadd.f32 %v699_v16, %v692_v5  ;;  %v683_v21 = vpop.f32.mrb[3].mxu0 }
 0x389   : > { %v702_v22 = vadd.f32 %v699_v16, %v693_v17 }
 0x38a   : > { %v703_v23 = vmin.f32 %v701_v20, 20.0 }
 0x38b   : > { %v704_v24 = vmin.f32 %v702_v22, 20.0 }
 0x38c   : > { %v705_v25 = vmul.f32 1.442695, %v703_v23 }
 0x38d   : > { %v707_v26 = vmul.f32 1.442695, %v704_v24 }
 0x38e   : > { %1280 = vpow2.f32 %v705_v25 }
 0x38f   : > { %1282 = vpow2.f32 %v707_v26 }
 0x398   : > { %v1281_v27 = vpop.eup %1280 }
 0x399   : > { %v1283_v28 = vpop.eup %1282  ;;  %v709_v29 = vadd.f32 1.0, %v1281_v27 }
 0x39a   : > { %v710_v1 = vadd.f32 1.0, %v1283_v28 }
 0x39b   : > { %v711_v31 = vmul.f32 %v709_v29, %v709_v29 }
 0x39c   : > { %v712_v32 = vmul.f32 %v710_v1, %v710_v1 }
 0x39d   : > { %v717_v33 = vadd.f32 1.0, %v711_v31  ;;  %v1075_v35 = vadd.f32 -1.0, %v711_v31 }
 0x39e   : > { %v718_v34 = vadd.f32 1.0, %v712_v32  ;;  %v1076_v36 = vadd.f32 -1.0, %v712_v32 }
 0x39f   : > { %1284 = vrcp.f32 %v717_v33  ;;  %v715_v37 = vmul.f32 %v1075_v35, %v701_v20 }
 0x3a0   : > { %1286 = vrcp.f32 %v718_v34  ;;  %v716_v41 = vmul.f32 %v1076_v36, %v702_v22 }
 0x3a9   : > { %v1285_v40 = vpop.eup %1284 }
 0x3aa   : > { %v1287_v42 = vpop.eup %1286  ;;  %v1674_v44 = vmul.f32 %v1285_v40, %v715_v37 }
 0x3ab   : > { %v1676_v45 = vmul.f32 %v1287_v42, %v716_v41 }
 0x3ad   : > { %v1219_v46 = vpack.i.bf16 %v1676_v45, %v1674_v44  ;;  %v1239_v47 = vpack.i.bf16 %v1674_v44, %v1676_v45 }
 0x3af   : > { %1220 = vrot.lane.b32.xlu1 %v1219_v46, %s1372_s13  ;;  %1215 = vrot.lane.b32.xlu0 %v1219_v46, %s1370_s8 }
 0x3b3   : > { %1230 = vrot.lane.b32.xlu1 %v1219_v46, %s1374_s15  ;;  %1225 = vrot.lane.b32.xlu0 %v1219_v46, %s1369_s29 }
 0x3b7   : > { %1240 = vrot.lane.b32.xlu1 %v1239_v47, %s1375_s18  ;;  %1235 = vrot.lane.b32.xlu0 %v1239_v47, %s1852_s16  ;;  %s1033_s16 = sshll.u32 %s269_s23, 5  ;;  %s1378_s18 = smov [#allocation2]  }
 0x3b8   : > { %s271_s19 = scalar_lea.vmem [#allocation2], %s1033_s16  ;;  %s1308_s14 = sshll.u32 %s1378_s18, 4  ;;  %s1309_s14 = int_to_ptr.vmem [resolvable:$false] %s1308_s14 }
 0x3b9   : > { %s967_s20 = sshll.u32 %s271_s19, 4  ;;  %s1766_s20 = int_to_ptr.vmem [resolvable:$true] %s967_s20 }
 0x3ba   : > { %s1304_s15 = scalar_lea.vmem %s1766_s20, 512  ;;  %p1311_p0 = scmp.lt.s32.totalorder %s1766_s20, %s1309_s14 }
 0x3bb   : > { %1250 = vrot.lane.b32.xlu1 %v1219_v46, %s1376_s21  ;;  %1245 = vrot.lane.b32.xlu0 %v1219_v46, %s1853_s17  ;;  %s1121_s17 = sshll.u32 %s1441_s28, 9  ;;  %s1770_s28 = scalar_lea.sflag [#allocation3], %s269_s23 }
 0x3bc   : > { %s1763_s29 = scalar_lea.hbm %s1819_s7, %s1121_s17  ;;  %p1305_p11 = scmp.ne.s32.totalorder %s1766_s20, %s1304_s15 }
 0x3bd   : > { %s1310_s21 = scalar_lea.vmem %s1309_s14, 1024 }
 0x3be   : > { %p1306_p12 = pnand %p1305_p11, %p1458_p5  ;;  %p1312_p1 = scmp.lt.s32.totalorder %s1310_s21, %s1304_s15 }
 0x3bf   : > { %881 = vperm.xlu1 %1213, %v1108_v38   ;;  %876 = vperm.xlu0 %1172, %v1107_v48  }
 0x3c0   : > { %p1307_p13 = pneg %p1306_p12  ;;  %p1313_p2 = por %p1312_p1, %p1311_p0 }
 0x3c2   : > { %p1314_p3 = pnand %p1313_p2, %p1307_p13 }
 0x3c3   : > { %898 = vperm.xlu1 %1213, %v1110_v50   ;;  %893 = vperm.xlu0 %1172, %v1109_v51  }
 0x421   : > { %v1221_v52 = vpop.permute.xlu1 %1220  ;;  %v1216_v53 = vpop.permute.xlu0 %1215 }
 0x422   : > { %v1223_v54 = vunpack.i.h.bf16 %v1221_v52  ;;  %v1222_v55 = vunpack.i.l.bf16 %v1221_v52  ;;  %v1218_v56 = vunpack.i.h.bf16 %v1216_v53  ;;  %v1217_v57 = vunpack.i.l.bf16 %v1216_v53 }
 0x424   : > { %v739_v58 = vsel %vm316_vm0, %v1222_v55, %v1223_v54  ;;  %v729_v60 = vsel %vm403_vm1, %v1217_v57, %v1218_v56  ;;  %v732_v61 = vsel %vm403_vm1, 0.0, %v1217_v57  ;;  %vm1854_vm0 = vcmask 121856   ;;  %vm1856_vm1 = vmpackc.low %vm1543_vm4, %vm1538_vm3 }
 0x425   : > { %v1081_v0 = vpack.c.bf16 %v739_v58, %v729_v60  ;;  %v1085_v2 = vpack.c.bf16 %v1222_v55, %v732_v61  ;;  %v1231_v8 = vpop.permute.xlu1 %1230  ;;  %v1226_v13 = vpop.permute.xlu0 %1225  ;;  %vm1855_vm7 = vmmov %vm1854_vm0 }
 0x426   : > { %v1233_v7 = vunpack.i.h.bf16 %v1231_v8  ;;  %v1232_v3 = vunpack.i.l.bf16 %v1231_v8  ;;  %v1228_v4 = vunpack.i.h.bf16 %v1226_v13  ;;  %v1227_v5 = vunpack.i.l.bf16 %v1226_v13  ;;  %vm1860_vm4 = vmpackc.low %vm1538_vm3, %vm1565_vm12 }
 0x427   : > { %1082 = vmatprep.subr.msk.bf16.mxu0 %vm1552_vm8, %v1081_v0  ;;  %vm1857_vm8 = vmpackc.low %vm1534_vm2, %vm1561_vm11  ;;  %vm1861_vm2 = vcmask 924672  }
 0x428   : > { %v757_v15 = vsel %vm441_vm9, %v1232_v3, %v1233_v7  ;;  %v760_v16 = vsel %vm441_vm9, 0.0, %v1232_v3  ;;  %v747_v17 = vsel %vm1854_vm0, %v1227_v5, %v1228_v4  ;;  %v750_v19 = vsel %vm1855_vm7, 0.0, %v1227_v5  ;;  %1086 = vmatpush1.bf16.msk.msra.mxu0 %vm1856_vm1, %v1085_v2  ;;  %vm1862_vm0 = vmmov %vm1861_vm2 }
 0x429   : > { %v1088_v20 = vpack.c.bf16 %v757_v15, %v747_v17  ;;  %v1091_v21 = vpack.c.bf16 %v760_v16, %v750_v19  ;;  %v1241_v22 = vpop.permute.xlu1 %1240  ;;  %v1236_v23 = vpop.permute.xlu0 %1235  ;;  %vm1858_vm9 = vcmask 1039360   ;;  %vm1863_vm1 = vcmask 908288  }
 0x42a   : > { %v1238_v10 = vunpack.i.h.bf16 %v1236_v23  ;;  %v1237_v24 = vunpack.i.l.bf16 %v1236_v23  ;;  %v1243_v25 = vunpack.i.h.bf16 %v1241_v22  ;;  %v1242_v26 = vunpack.i.l.bf16 %v1241_v22  ;;  %vm1859_vm7 = vmmov %vm1858_vm9 }
 0x42b   : > { %1089 = vmatprep.subr.msk.bf16.mxu0 %vm1857_vm8, %v1088_v20  ;;  %vm1864_vm3 = vmmov %vm1863_vm1 }
 0x42c   : > { %v767_v63 = vsel %vm1858_vm9, %v1238_v10, %v1237_v24  ;;  %v770_v27 = vsel %vm1859_vm7, %v1237_v24, 0.0  ;;  %1092 = vmatpush1.bf16.msk.msra.mxu0 %vm1860_vm4, %v1091_v21  ;;  %v777_v35 = vsel %vm1861_vm2, %v1243_v25, %v1242_v26  ;;  %v780_v36 = vsel %vm1862_vm0, %v1242_v26, 0.0 }
 0x42d   : > { %v1094_v28 = vpack.c.bf16 %v770_v27, %v1676_v45  ;;  %v1097_v29 = vpack.c.bf16 %v767_v63, %v1674_v44  ;;  %v1251_v1 = vpop.permute.xlu1 %1250  ;;  %v1246_v59 = vpop.permute.xlu0 %1245 }
 0x42e   : > { %v1253_v31 = vunpack.i.h.bf16 %v1251_v1  ;;  %v1252_v32 = vunpack.i.l.bf16 %v1251_v1  ;;  %v1248_v33 = vunpack.i.h.bf16 %v1246_v59  ;;  %v1247_v34 = vunpack.i.l.bf16 %v1246_v59 }
 0x42f   : > { %1095 = vmatprep.subr.msk.bf16.mxu0 %vm1592_vm10, %v1094_v28 }
 0x430   : > { %v798_v62 = vsel %vm1863_vm1, %v1253_v31, 0.0  ;;  %v795_v37 = vsel %vm1864_vm3, %v1252_v32, %v1253_v31  ;;  %v1100_v40 = vpack.c.bf16 %v1248_v33, %v780_v36  ;;  %v787_v41 = vsel %vm474_vm13, %v1247_v34, %v1248_v33  ;;  %1098 = vmatpush1.bf16.msk.msra.mxu0 %vm1614_vm5, %v1097_v29 }
 0x431   : > { %v800_v42 = vsel %vm1561_vm11, %v798_v62, 0.0  ;;  %v1103_v44 = vpack.c.bf16 %v787_v41, %v777_v35  ;;  %v799_v45 = vsel %vm1565_vm12, %v795_v37, 0.0  ;;  %vm1865_vm5 = vcmask 588800  }
 0x432   : > { %v810_v46 = vpack.c.bf16 %v800_v42, %v800_v42  ;;  %1101 = vmatprep.subr.msk.bf16.mxu0 %vm1622_vm15, %v1100_v40  ;;  %v809_v30 = vpack.c.bf16 %v799_v45, %v799_v45 }
 0x434   : > { %1104 = vmatpush1.bf16.msk.msra.mxu0 %vm1639_vm14, %v1103_v44  ;;  %v823_v39 = vsel %vm511_vm6, %v809_v30, 0 }
 0x435   : > { %1105 = vmatprep.subr.msk.bf16.mxu0 %vm511_vm6, %v810_v46 }
 0x438   : > { %837 = vmatpush1.bf16.msra.mxu0 %v823_v39 }
 0x43b   : > { %1106 = vmatmul.mubr.msk.bf16.vlgmr.msra.gmra.mrb[4].mxu0 %vm1865_vm5, %v1255_v14 }
 0x43e   : > { %v877_v18 = vpop.permute.xlu0 %876  ;;  %v882_v47 = vpop.permute.xlu1 %881 }
 0x442   : > { %v894_v50 = vpop.permute.xlu0 %893  ;;  %v899_v55 = vpop.permute.xlu1 %898 }
 0x50e   : > { %v862_v38 = vpop.f32.mrb[4].mxu0 }
 0x50f   : > { %v884_v43 = vmul.f32 %v877_v18, %v862_v38  ;;  %v864_v48 = vpop.f32.mrb[5].mxu0 }
 0x510   : > { %v885_v51 = vmul.f32 %v877_v18, %v864_v48  ;;  %v866_v49 = vpop.f32.mrb[6].mxu0 }
 0x511   : > { %v901_v52 = vadd.f32 %v894_v50, %v884_v43  ;;  %v886_v53 = vmul.f32 %v882_v47, %v866_v49  ;;  %v868_v54 = vpop.f32.mrb[7].mxu0 }
 0x512   : > { %v902_v56 = vadd.f32 %v894_v50, %v885_v51  ;;  %v887_v57 = vmul.f32 %v882_v47, %v868_v54 }
 0x513   : > { %v905_v58 = vmin.f32 %v901_v52, 20.0  ;;  %v903_v60 = vadd.f32 %v899_v55, %v886_v53 }
 0x514   : > { %v906_v61 = vmin.f32 %v902_v56, 20.0  ;;  %v904_v0 = vadd.f32 %v899_v55, %v887_v57 }
 0x515   : > { %v909_v2 = vmul.f32 1.442695, %v905_v58  ;;  %v907_v8 = vmin.f32 %v903_v60, 20.0 }
 0x516   : > { %v911_v13 = vmul.f32 1.442695, %v906_v61  ;;  %v908_v7 = vmin.f32 %v904_v0, 20.0 }
 0x517   : > { %1288 = vpow2.f32 %v909_v2  ;;  %v913_v3 = vmul.f32 1.442695, %v907_v8 }
 0x518   : > { %1290 = vpow2.f32 %v911_v13  ;;  %v915_v4 = vmul.f32 1.442695, %v908_v7 }
 0x519   : > { %1292 = vpow2.f32 %v913_v3 }
 0x51a   : > { %1294 = vpow2.f32 %v915_v4 }
 0x521   : > { %v1289_v5 = vpop.eup %1288 }
 0x522   : > { %v1291_v15 = vpop.eup %1290  ;;  %v917_v16 = vadd.f32 1.0, %v1289_v5 }
 0x523   : > { %v1293_v17 = vpop.eup %1292  ;;  %v918_v19 = vadd.f32 1.0, %v1291_v15 }
 0x524   : > { %v1295_v20 = vpop.eup %1294  ;;  %v921_v21 = vmul.f32 %v917_v16, %v917_v16  ;;  %v919_v22 = vadd.f32 1.0, %v1293_v17 }
 0x525   : > { %v922_v23 = vmul.f32 %v918_v19, %v918_v19  ;;  %v920_v10 = vadd.f32 1.0, %v1295_v20 }
 0x526   : > { %v933_v24 = vadd.f32 1.0, %v921_v21  ;;  %v923_v25 = vmul.f32 %v919_v22, %v919_v22  ;;  %v1111_v29 = vadd.f32 -1.0, %v921_v21 }
 0x527   : > { %v934_v26 = vadd.f32 1.0, %v922_v23  ;;  %v924_v63 = vmul.f32 %v920_v10, %v920_v10  ;;  %v1112_v1 = vadd.f32 -1.0, %v922_v23 }
 0x528   : > { %1296 = vrcp.f32 %v933_v24  ;;  %v935_v27 = vadd.f32 1.0, %v923_v25  ;;  %v1113_v59 = vadd.f32 -1.0, %v923_v25  ;;  %v929_v32 = vmul.f32 %v1111_v29, %v901_v52 }
 0x529   : > { %1298 = vrcp.f32 %v934_v26  ;;  %v936_v28 = vadd.f32 1.0, %v924_v63  ;;  %v1114_v31 = vadd.f32 -1.0, %v924_v63  ;;  %v930_v34 = vmul.f32 %v1112_v1, %v902_v56 }
 0x52a   : > { %1300 = vrcp.f32 %v935_v27  ;;  %v931_v62 = vmul.f32 %v1113_v59, %v903_v60 }
 0x52b   : > { %1302 = vrcp.f32 %v936_v28  ;;  %v932_v41 = vmul.f32 %v1114_v31, %v904_v0 }
 0x532   : > { %v1297_v33 = vpop.eup %1296 }
 0x533   : > { %v1299_v35 = vpop.eup %1298  ;;  %v941_v36 = vmul.f32 %v1297_v33, %v929_v32 }
 0x534   : > { %v1301_v37 = vpop.eup %1300  ;;  %v942_v40 = vmul.f32 %v1299_v35, %v930_v34 }
 0x535   : > { %v1303_v42 = vpop.eup %1302  ;;  %v945_v44 = vadd.f32 %v941_v36, %v1663_v12  ;;  %v943_v45 = vmul.f32 %v1301_v37, %v931_v62 }
 0x536   : > { %v946_v46 = vadd.f32 %v942_v40, %v1657_v9  ;;  %v944_v30 = vmul.f32 %v1303_v42, %v932_v41 }
 0x537   : > { %949 = vst [vmem:[%s271_s19] sm:$0xff] %v945_v44  ;;  %v947_v39 = vadd.f32 %v943_v45, %v1654_v6 }
 0x538   : > { %950 = vst [vmem:[%s271_s19 + $0x8] sm:$0xff] %v946_v46  ;;  %v948_v14 = vadd.f32 %v944_v30, %v1660_v11 }
 0x539   : > { %951 = vst [vmem:[%s271_s19 + $0x10] sm:$0xff] %v947_v39 }
 0x53a   : > { %952 = vst [vmem:[%s271_s19 + $0x18] sm:$0xff] %v948_v14 }
 0x53b   : > { %1317 = shalt.err (!%p1314_p3)
}
 0x53c   : > { %s1318_s22 = scalar_lea.hbm %s1763_s29, 512  ;;  %s1322_s17 = scalar_lea.hbm %s1819_s7, 1024 }
 0x53d   : > { %p1319_p4 = scmp.ne.s32.totalorder %s1763_s29, %s1318_s22  ;;  %p1323_p9 = scmp.lt.u32.totalorder %s1763_s29, %s1819_s7 }
 0x53e   : > { %p1324_p10 = scmp.lt.u32.totalorder %s1322_s17, %s1318_s22  ;;  %p1326_p12 = scmp.lt.u32.totalorder %s1318_s22, %s1763_s29 }
 0x53f   : > { %p1320_p7 = pnand %p1319_p4, %p1458_p5 }
 0x540   : > { %p1325_p11 = por %p1324_p10, %p1323_p9 }
 0x541   : > { %p1321_p8 = pneg %p1320_p7 }
 0x542   : > { %p1327_p13 = por %p1326_p12, %p1325_p11 }
 0x544   : > { %p1328_p0 = pnand %p1327_p13, %p1321_p8 }
 0x546   : > { %1331 = shalt.err (!%p1328_p0)
}
 0x547   : > { %s1379_s9 = smov 256  }
 0x548   : > { %1122 = dma.vmem_to_hbm [thread:$0]  (%p1458_p5), %s1766_s20, 512, %s1763_s29, %s1770_s28, %s1379_s9, %s1379_s9, %s1372_s13  }
 0x549 PF: > { %p1128_p1 = scmp.ge.s32.totalorder %s1366_s27, 2  ;;  %s982_s15 = sand.u32 1, %s1354_s24  }
 0x54a   : > { %s983_s18 = scalar_lea.sflag [#allocation3], %s982_s15 }
 0x54b   : > { %p1125_p2 = pnand %p1128_p1, %p1462_p6 }
 0x54d   : > { %1349 = dma.done.wait (!%p1125_p2), %s983_s18, 512  }
 0x54e   : > { %1351 = vsyncadd (!%p1125_p2), %s983_s18, 4294966784  ;;  %p17_p3 = scmp.ge.s32.totalorder %s1445_s30, 4   ;;  %s1866_s24 = smov %s1358_s25 }
 0x54f   : > { %s1867_s25 = smov %s1362_s26  ;;  %s1868_s26 = smov %s1456_s10 }
 0x550   : > { %s1869_s27 = smov %s1445_s30  ;;  %19 = sbr.rel (!%p17_p3) target bundleno = 3 (0x3), region = 89 }
 0x557   :  { %988 = vsyncpa [#allocation3], 1 }
 0x558   :  { %990 = vsyncpa [#allocation3 + $0x1], 1 }

</bundles_post_ra>
